<compile_context>
chip_gen: v6e
topology: v6e:2x2x1
jax: 0.10.0
libtpu: 0.0.40
codegen_flags: <defaults>
</compile_context>

<pallas_src>
import jax
import jax.numpy as jnp
from jax.experimental import pallas as pl
from jax.experimental.pallas import tpu as pltpu

# Logical and lane-padded feature sizes.
IN_F = 28 * 28                # 784 (NOT padded: multiple of 16, full-extent block)
H1_F, H1_P = 500, 512
H2_F, H2_P = 100, 128
OUT_F, OUT_P = 10, 128

TB_MAX = 512                  # max batch tile (multiple of 256, MXU M granularity)
NEG_BIG = -1e30               # bias for padded output classes -> softmax prob 0


def _cdiv(a, b):
    return -(-a // b)


def _round_up(n, m):
    return _cdiv(n, m) * m


def _choose_batch_tiling(B):
    """Pick (TB, B_pad, grid_m): tiles <= TB_MAX, padding balanced against B,
    and >= 2 grid steps for large batches so v7x megacore sharding has work."""
    n_tiles = _cdiv(B, TB_MAX)
    if n_tiles < 2 and B >= 512:
        n_tiles = 2                       # give both v7x TensorCores a tile
    tb = _cdiv(B, n_tiles)
    # 128-row alignment for big tiles keeps the MXU M dim full on all gens;
    # 16-row alignment (bf16 sublane pack) is enough for small batches.
    align = 128 if tb >= 128 else 16
    TB = _round_up(tb, align)
    B_pad = _round_up(B, TB)
    return TB, B_pad, B_pad // TB


def _mlp_softmax_kernel(x_ref, w1_ref, b1_ref, w2_ref, b2_ref, w3_ref, b3_ref, o_ref):
    """One batch tile: 3x (MXU matmul + bias) with ReLU, then stable softmax.

    x_ref: (TB, 784) f32 (cast to bf16 in-register). Weights: bf16, (in, out)
    layout. Biases: f32 (1, N). Output: (TB, 128) bf16 probabilities.
    """
    x = x_ref[...].astype(jnp.bfloat16)                                # (TB, 784)

    h1 = jnp.dot(x, w1_ref[...], preferred_element_type=jnp.float32) + b1_ref[...]
    h1 = jnp.maximum(h1, 0.0).astype(jnp.bfloat16)                     # (TB, 512)

    h2 = jnp.dot(h1, w2_ref[...], preferred_element_type=jnp.float32) + b2_ref[...]
    h2 = jnp.maximum(h2, 0.0).astype(jnp.bfloat16)                     # (TB, 128)

    logits = jnp.dot(h2, w3_ref[...], preferred_element_type=jnp.float32) + b3_ref[...]

    # Numerically stable softmax over classes (all in f32); padded classes have
    # bias -1e30, so exp(padded - max) == 0 and they add nothing to the denom.
    m = jnp.max(logits, axis=1, keepdims=True)
    e = jnp.exp(logits - m)
    denom = jnp.sum(e, axis=1, keepdims=True)
    probs = e * pl.reciprocal(denom, approx=True)
    o_ref[...] = probs.astype(o_ref.dtype)


@jax.jit
def neural_network_forward(x_nchw, padded_params):
    """x_nchw: (B, 1, 28, 28) f32. padded_params from prepare_params().
    Returns softmax probabilities (B, 10) in float32."""
    w1, b1, w2, b2, w3, b3 = padded_params
    B = x_nchw.shape[0]

    TB, B_pad, grid_m = _choose_batch_tiling(B)

    # nn.Flatten(); batch-pad only if needed (no feature pad, no dtype cast).
    x_flat = x_nchw.reshape(B, IN_F)
    if B_pad != B:
        x_flat = jnp.pad(x_flat, ((0, B_pad - B), (0, 0)))

    flops = 2 * B_pad * (IN_F * H1_P + H1_P * H2_P + H2_P * OUT_P)
    transcendentals = B_pad * (OUT_P + 1)                      # exp + reciprocal
    bytes_accessed = (
        x_flat.size * 4                                        # f32 input
        + (w1.size + w2.size + w3.size) * 2                    # bf16 weights
        + (b1.size + b2.size + b3.size) * 4                    # f32 biases
        + B_pad * OUT_P * 2                                    # bf16 output
    )

    out = pl.pallas_call(
        _mlp_softmax_kernel,
        out_shape=jax.ShapeDtypeStruct((B_pad, OUT_P), jnp.bfloat16),
        grid=(grid_m,),
        in_specs=[
            pl.BlockSpec((TB, IN_F), lambda i: (i, 0)),        # x tile per step
            pl.BlockSpec((IN_F, H1_P), lambda i: (0, 0)),      # weights/biases:
            pl.BlockSpec((1, H1_P), lambda i: (0, 0)),         # constant index_map
            pl.BlockSpec((H1_P, H2_P), lambda i: (0, 0)),      # -> VMEM-resident
            pl.BlockSpec((1, H2_P), lambda i: (0, 0)),
            pl.BlockSpec((H2_P, OUT_P), lambda i: (0, 0)),
            pl.BlockSpec((1, OUT_P), lambda i: (0, 0)),
        ],
        out_specs=pl.BlockSpec((TB, OUT_P), lambda i: (i, 0)),
        compiler_params=pltpu.CompilerParams(
            dimension_semantics=("parallel",),                 # v7x megacore
            vmem_limit_bytes=32 * 1024 * 1024,
        ),
        cost_estimate=pl.CostEstimate(
            flops=flops,
            transcendentals=transcendentals,
            bytes_accessed=bytes_accessed,
        ),
    )(x_flat, w1, b1, w2, b2, w3, b3)

    return out[:B, :OUT_F].astype(jnp.float32)


def init_params(key):
    """Reference f32 params, nn.Linear-style init. Weights stored transposed
    as (in_features, out_features)."""
    k1, k2, k3, k4, k5, k6 = jax.random.split(key, 6)

    def linear(kw, kb, fan_in, fan_out):
        bound = 1.0 / jnp.sqrt(fan_in)
        w = jax.random.uniform(kw, (fan_in, fan_out), jnp.float32, -bound, bound)
        b = jax.random.uniform(kb, (fan_out,), jnp.float32, -bound, bound)
        return w, b

    w1, b1 = linear(k1, k2, IN_F, H1_F)
    w2, b2 = linear(k3, k4, H1_F, H2_F)
    w3, b3 = linear(k5, k6, H2_F, OUT_F)
    return (w1, b1, w2, b2, w3, b3)


def prepare_params(params):
    """One-time (not per-call) output-feature padding to 128-lane multiples +
    bf16 weights. Input features of layer 1 stay at 784 (no pad). Zero padding
    is exact through matmul+ReLU; padded output-class biases are -1e30 so their
    softmax probability is exactly 0."""
    w1, b1, w2, b2, w3, b3 = params

    def pad_w(w, rows, cols):
        wp = jnp.zeros((rows, cols), jnp.float32).at[: w.shape[0], : w.shape[1]].set(w)
        return wp.astype(jnp.bfloat16)

    def pad_b(b, cols, fill=0.0):
        bp = jnp.full((1, cols), fill, jnp.float32)
        return bp.at[0, : b.shape[0]].set(b)

    return (
        pad_w(w1, IN_F, H1_P), pad_b(b1, H1_P),
        pad_w(w2, H1_P, H2_P), pad_b(b2, H2_P),
        pad_w(w3, H2_P, OUT_P), pad_b(b3, OUT_P, fill=NEG_BIG),
    )


if __name__ == "__main__":
    key = jax.random.PRNGKey(0)
    kx, kp = jax.random.split(key)

    B = 8
    x = jax.random.normal(kx, (B, 1, 28, 28), dtype=jnp.float32)  # NCHW like PyTorch
    params = init_params(kp)
    padded_params = prepare_params(params)

    probs = neural_network_forward(x, padded_params)
    jax.block_until_ready(probs)

    assert probs.shape == (B, OUT_F)

    # Softmax rows sum to ~1 (approx reciprocal + bf16 output -> loose tol).
    row_sums = jnp.sum(probs, axis=1)
    assert jnp.allclose(row_sums, jnp.ones((B,), jnp.float32), atol=1e-2), row_sums

    # Pure-JAX f32 reference (unpadded weights); kernel uses bf16 weights and
    # bf16 output, so compare with a correspondingly loosened tolerance.
    w1, b1, w2, b2, w3, b3 = params
    xf = x.reshape(B, -1)
    h1 = jnp.maximum(xf @ w1 + b1[None, :], 0.0)
    h2 = jnp.maximum(h1 @ w2 + b2[None, :], 0.0)
    ref = jax.nn.softmax(h2 @ w3 + b3[None, :], axis=1)
    assert jnp.allclose(probs, ref, atol=3e-2), float(jnp.max(jnp.abs(probs - ref)))

    print("KERNEL_OK")
</pallas_src>

<mosaic_0001>
module attributes {stable_mosaic.version = 11 : i64} {
  func.func @_mlp_softmax_kernel(%arg0: i32, %arg1: memref<16x784xf32, #tpu.memory_space<vmem>>, %arg2: memref<784x512xbf16, #tpu.memory_space<vmem>>, %arg3: memref<1x512xf32, #tpu.memory_space<vmem>>, %arg4: memref<512x128xbf16, #tpu.memory_space<vmem>>, %arg5: memref<1x128xf32, #tpu.memory_space<vmem>>, %arg6: memref<128x128xbf16, #tpu.memory_space<vmem>>, %arg7: memref<1x128xf32, #tpu.memory_space<vmem>>, %arg8: memref<16x128xbf16, #tpu.memory_space<vmem>>) attributes {dimension_semantics = [#tpu.dimension_semantics<parallel>], iteration_bounds = array<i64: 1>, scalar_prefetch = 0 : i64, scratch_operands = 0 : i64, tpu.core_type = #tpu.core_type<tc>, window_params = [{transform_indices = @transform_0, window_bounds = array<i64: 16, 784>}, {pipeline_mode = #tpu.pipeline_mode<synchronous>, transform_indices = @transform_1, window_bounds = array<i64: 784, 512>}, {pipeline_mode = #tpu.pipeline_mode<synchronous>, transform_indices = @transform_2, window_bounds = array<i64: 1, 512>}, {pipeline_mode = #tpu.pipeline_mode<synchronous>, transform_indices = @transform_3, window_bounds = array<i64: 512, 128>}, {pipeline_mode = #tpu.pipeline_mode<synchronous>, transform_indices = @transform_4, window_bounds = array<i64: 1, 128>}, {pipeline_mode = #tpu.pipeline_mode<synchronous>, transform_indices = @transform_5, window_bounds = array<i64: 128, 128>}, {pipeline_mode = #tpu.pipeline_mode<synchronous>, transform_indices = @transform_6, window_bounds = array<i64: 1, 128>}, {transform_indices = @transform_7, window_bounds = array<i64: 16, 128>}]} {
    %c0 = arith.constant 0 : index
    %c0_0 = arith.constant 0 : index
    %0 = vector.load %arg1[%c0, %c0_0] : memref<16x784xf32, #tpu.memory_space<vmem>>, vector<16x784xf32>
    %1 = arith.truncf %0 : vector<16x784xf32> to vector<16x784xbf16>
    %c0_1 = arith.constant 0 : index
    %c0_2 = arith.constant 0 : index
    %2 = vector.load %arg2[%c0_1, %c0_2] : memref<784x512xbf16, #tpu.memory_space<vmem>>, vector<784x512xbf16>
    %cst = arith.constant dense<0.000000e+00> : vector<16x512xf32>
    %3 = tpu.matmul %1, %2, %cst {dimension_numbers = #tpu.dot_dimension_numbers<[1], [0], [0], [1], [0, 0, 1, 1], [], []>} : vector<16x784xbf16>, vector<784x512xbf16>, vector<16x512xf32> -> vector<16x512xf32>
    %c0_3 = arith.constant 0 : index
    %c0_4 = arith.constant 0 : index
    %4 = vector.load %arg3[%c0_3, %c0_4] : memref<1x512xf32, #tpu.memory_space<vmem>>, vector<1x512xf32>
    %5 = vector.broadcast %4 : vector<1x512xf32> to vector<16x512xf32>
    %6 = arith.addf %3, %5 : vector<16x512xf32>
    %cst_5 = arith.constant 0.000000e+00 : f32
    %7 = vector.broadcast %cst_5 : f32 to vector<16x512xf32>
    %8 = arith.maximumf %6, %7 : vector<16x512xf32>
    %9 = arith.truncf %8 : vector<16x512xf32> to vector<16x512xbf16>
    %c0_6 = arith.constant 0 : index
    %c0_7 = arith.constant 0 : index
    %10 = vector.load %arg4[%c0_6, %c0_7] : memref<512x128xbf16, #tpu.memory_space<vmem>>, vector<512x128xbf16>
    %cst_8 = arith.constant dense<0.000000e+00> : vector<16x128xf32>
    %11 = tpu.matmul %9, %10, %cst_8 {dimension_numbers = #tpu.dot_dimension_numbers<[1], [0], [0], [1], [0, 0, 1, 1], [], []>} : vector<16x512xbf16>, vector<512x128xbf16>, vector<16x128xf32> -> vector<16x128xf32>
    %c0_9 = arith.constant 0 : index
    %c0_10 = arith.constant 0 : index
    %12 = vector.load %arg5[%c0_9, %c0_10] : memref<1x128xf32, #tpu.memory_space<vmem>>, vector<1x128xf32>
    %13 = vector.broadcast %12 : vector<1x128xf32> to vector<16x128xf32>
    %14 = arith.addf %11, %13 : vector<16x128xf32>
    %cst_11 = arith.constant 0.000000e+00 : f32
    %15 = vector.broadcast %cst_11 : f32 to vector<16x128xf32>
    %16 = arith.maximumf %14, %15 : vector<16x128xf32>
    %17 = arith.truncf %16 : vector<16x128xf32> to vector<16x128xbf16>
    %c0_12 = arith.constant 0 : index
    %c0_13 = arith.constant 0 : index
    %18 = vector.load %arg6[%c0_12, %c0_13] : memref<128x128xbf16, #tpu.memory_space<vmem>>, vector<128x128xbf16>
    %cst_14 = arith.constant dense<0.000000e+00> : vector<16x128xf32>
    %19 = tpu.matmul %17, %18, %cst_14 {dimension_numbers = #tpu.dot_dimension_numbers<[1], [0], [0], [1], [0, 0, 1, 1], [], []>} : vector<16x128xbf16>, vector<128x128xbf16>, vector<16x128xf32> -> vector<16x128xf32>
    %c0_15 = arith.constant 0 : index
    %c0_16 = arith.constant 0 : index
    %20 = vector.load %arg7[%c0_15, %c0_16] : memref<1x128xf32, #tpu.memory_space<vmem>>, vector<1x128xf32>
    %21 = vector.broadcast %20 : vector<1x128xf32> to vector<16x128xf32>
    %22 = arith.addf %19, %21 : vector<16x128xf32>
    %cst_17 = arith.constant dense<0xFF800000> : vector<16xf32>
    %23 = vector.multi_reduction <maximumf>, %22, %cst_17 [1] : vector<16x128xf32> to vector<16xf32>
    %24 = vector.shape_cast %23 : vector<16xf32> to vector<16x1xf32>
    %25 = vector.broadcast %24 : vector<16x1xf32> to vector<16x128xf32>
    %26 = arith.subf %22, %25 : vector<16x128xf32>
    %27 = math.exp %26 : vector<16x128xf32>
    %cst_18 = arith.constant dense<0.000000e+00> : vector<16xf32>
    %28 = vector.multi_reduction <add>, %27, %cst_18 [1] : vector<16x128xf32> to vector<16xf32>
    %29 = vector.shape_cast %28 : vector<16xf32> to vector<16x1xf32>
    %30 = tpu.reciprocal %29 {approx = true} : vector<16x1xf32> -> vector<16x1xf32>
    %31 = vector.broadcast %30 : vector<16x1xf32> to vector<16x128xf32>
    %32 = arith.mulf %27, %31 : vector<16x128xf32>
    %33 = arith.truncf %32 : vector<16x128xf32> to vector<16x128xbf16>
    %c0_19 = arith.constant 0 : index
    %c0_20 = arith.constant 0 : index
    %34 = vector.load %arg8[%c0_19, %c0_20] : memref<16x128xbf16, #tpu.memory_space<vmem>>, vector<16x128xbf16>
    tpu.vector_store %arg8[%c0_19, %c0_20], %33 {strides = array<i32>} : memref<16x128xbf16, #tpu.memory_space<vmem>>, vector<16x128xbf16>,
    return
  }
  func.func @transform_0(%arg0: i32) -> (i32, i32) {
    %c0_i32 = arith.constant 0 : i32
    %c0_i32_0 = arith.constant 0 : i32
    return %arg0, %c0_i32 : i32, i32
  }
  func.func @transform_1(%arg0: i32) -> (i32, i32) {
    %c0_i32 = arith.constant 0 : i32
    %c0_i32_0 = arith.constant 0 : i32
    %c0_i32_1 = arith.constant 0 : i32
    return %c0_i32, %c0_i32_0 : i32, i32
  }
  func.func @transform_2(%arg0: i32) -> (i32, i32) {
    %c0_i32 = arith.constant 0 : i32
    %c0_i32_0 = arith.constant 0 : i32
    %c0_i32_1 = arith.constant 0 : i32
    return %c0_i32, %c0_i32_0 : i32, i32
  }
  func.func @transform_3(%arg0: i32) -> (i32, i32) {
    %c0_i32 = arith.constant 0 : i32
    %c0_i32_0 = arith.constant 0 : i32
    %c0_i32_1 = arith.constant 0 : i32
    return %c0_i32, %c0_i32_0 : i32, i32
  }
  func.func @transform_4(%arg0: i32) -> (i32, i32) {
    %c0_i32 = arith.constant 0 : i32
    %c0_i32_0 = arith.constant 0 : i32
    %c0_i32_1 = arith.constant 0 : i32
    return %c0_i32, %c0_i32_0 : i32, i32
  }
  func.func @transform_5(%arg0: i32) -> (i32, i32) {
    %c0_i32 = arith.constant 0 : i32
    %c0_i32_0 = arith.constant 0 : i32
    %c0_i32_1 = arith.constant 0 : i32
    return %c0_i32, %c0_i32_0 : i32, i32
  }
  func.func @transform_6(%arg0: i32) -> (i32, i32) {
    %c0_i32 = arith.constant 0 : i32
    %c0_i32_0 = arith.constant 0 : i32
    %c0_i32_1 = arith.constant 0 : i32
    return %c0_i32, %c0_i32_0 : i32, i32
  }
  func.func @transform_7(%arg0: i32) -> (i32, i32) {
    %c0_i32 = arith.constant 0 : i32
    %c0_i32_0 = arith.constant 0 : i32
    return %arg0, %c0_i32 : i32, i32
  }
}

</mosaic_0001>

<bundles_post_ra>
// kernel: neural_network_forward.1
= control target key start
LH: loop header
LB: loop body
LE: loop exit
PB: predicated region body
PF: predicated region fallthrough
CT: control target
= control target key end

     0   :  { %12 = vsyncpa [#allocation3], 0  ;;  %s2805_s24 = smov [#allocation2]   ;;  %s3060_s0 = inlined_call_operand.vmem [shape: f32[16,784], index: 0, kind: input, shape index: {}]   ;;  %s3061_s1 = inlined_call_operand.hbm [shape: bf16[784,512], index: 1, kind: input, shape index: {}]   ;;  %s3062_s2 = inlined_call_operand.vmem [shape: f32[1,512], index: 2, kind: input, shape index: {}]   ;;  %s3063_s3 = inlined_call_operand.vmem [shape: bf16[512,128], index: 3, kind: input, shape index: {}]   ;;  %s3064_s4 = inlined_call_operand.vmem [shape: f32[1,128], index: 4, kind: input, shape index: {}]   ;;  %s3065_s5 = inlined_call_operand.vmem [shape: bf16[128,128], index: 5, kind: input, shape index: {}]   ;;  %s3066_s6 = inlined_call_operand.vmem [shape: f32[1,128], index: 6, kind: input, shape index: {}]   ;;  %s3067_s7 = inlined_call_operand.vmem [shape: bf16[16,128], index: 7, kind: output, shape index: {}]  }
   0x1   :  { %s20_s25 = sshll.u32 %s2805_s24, 4  ;;  %s21_s25 = int_to_ptr.vmem [resolvable:$true] %s20_s25 }
   0x2   :  { %s2791_s26 = scalar_lea.vmem %s21_s25, 25088  ;;  %p2796_p1 = scmp.lt.s32.totalorder %s21_s25, %s21_s25 }
   0x3   :  { %p2792_p0 = scmp.ne.s32.totalorder %s21_s25, %s2791_s26  ;;  %p2797_p2 = scmp.lt.s32.totalorder %s2791_s26, %s2791_s26 }
   0x5   :  { %p2798_p3 = por %p2797_p2, %p2796_p1 }
   0x7   :  { %p2799_p4 = pnand %p2798_p3, %p2792_p0 }
   0x9   :  { %2802 = shalt.err (!%p2799_p4)
}
   0xa   :  { %s2806_s27 = smov 256   ;;  %s2807_s28 = smov 16  }
   0xb   :  { %26 = dma.hbm_to_vmem [thread:$0]  %s3061_s1, 25088, %s21_s25, [#allocation3], %s2806_s27, %s2806_s27, %s2807_s28  }
   0xc   :  { %2803 = dma.done.wait [#allocation3], 25088  }
   0xd   :  { %2804 = vsyncadd [#allocation3], 4294942208  ;;  %v2441_v0 = vld [vmem:[#allocation2 + $0xe4] ss:$16 sps:$4 sm:$0xff]   ;;  %v2445_v2 = vld [vmem:[#allocation2 + $0xe0] ss:$16 sps:$4 sm:$0xff]  }
   0xe   :  { %v2443_v1 = vld [vmem:[#allocation2 + $0x2e4] ss:$16 sps:$4 sm:$0xff]   ;;  %1264 = vmatprep.subr.bf16.mxu0 %v2441_v0  ;;  %v2446_v3 = vld [vmem:[#allocation2 + $0x2e0] ss:$16 sps:$4 sm:$0xff]   ;;  %v42_v46 = vld [vmem:[%s3060_s0 + $0x8] sm:$0xff]  ;;  %vm1260_vm0 = vcmask 130048  }
   0xf   :  { %1307 = vmatprep.subr.bf16.mxu1 %v2443_v1  ;;  %v2447_v4 = vld [vmem:[#allocation2 + $0xc4] ss:$16 sps:$4 sm:$0xff]   ;;  %1265 = vmatpush1.bf16.msra.mxu0 %v2445_v2  ;;  %v2451_v6 = vld [vmem:[#allocation2 + $0xc0] ss:$16 sps:$4 sm:$0xff]   ;;  %v44_v48 = vld [vmem:[%s3060_s0 + $0x18] sm:$0xff]  ;;  %vm2810_vm1 = vmmov 0  }
  0x10   :  { %1308 = vmatpush1.bf16.msra.mxu1 %v2446_v3  ;;  %v2449_v5 = vld [vmem:[#allocation2 + $0x2c4] ss:$16 sps:$4 sm:$0xff]   ;;  %1266 = vmatprep.subr.bf16.mxu0 %v2447_v4  ;;  %v2452_v7 = vld [vmem:[#allocation2 + $0x2c0] ss:$16 sps:$4 sm:$0xff]  }
  0x11   :  { %1309 = vmatprep.subr.bf16.mxu1 %v2449_v5  ;;  %v2453_v8 = vld [vmem:[#allocation2 + $0xa4] ss:$16 sps:$4 sm:$0xff]   ;;  %v2457_v10 = vld [vmem:[#allocation2 + $0xa0] ss:$16 sps:$4 sm:$0xff]  }
  0x12   :  { %v2455_v9 = vld [vmem:[#allocation2 + $0x2a4] ss:$16 sps:$4 sm:$0xff]   ;;  %v2458_v11 = vld [vmem:[#allocation2 + $0x2a0] ss:$16 sps:$4 sm:$0xff]  }
  0x13   :  { %1267 = vmatpush1.bf16.msra.mxu0 %v2451_v6  ;;  %v2459_v12 = vld [vmem:[#allocation2 + $0x84] ss:$16 sps:$4 sm:$0xff]   ;;  %v2463_v14 = vld [vmem:[#allocation2 + $0x80] ss:$16 sps:$4 sm:$0xff]  }
  0x14   :  { %1310 = vmatpush1.bf16.msra.mxu1 %v2452_v7  ;;  %1268 = vmatprep.subr.bf16.mxu0 %v2453_v8  ;;  %v2461_v13 = vld [vmem:[#allocation2 + $0x284] ss:$16 sps:$4 sm:$0xff]   ;;  %v2464_v15 = vld [vmem:[#allocation2 + $0x280] ss:$16 sps:$4 sm:$0xff]   ;;  %v48_v7 = vld [vmem:[%s3060_s0 + $0x38] sm:$0xff] }
  0x15   :  { %1311 = vmatprep.subr.bf16.mxu1 %v2455_v9  ;;  %v2465_v16 = vld [vmem:[#allocation2 + $0x64] ss:$16 sps:$4 sm:$0xff]   ;;  %v2469_v18 = vld [vmem:[#allocation2 + $0x60] ss:$16 sps:$4 sm:$0xff]   ;;  %v50_v9 = vld [vmem:[%s3060_s0 + $0x48] sm:$0xff] }
  0x16   :  { %v2467_v17 = vld [vmem:[#allocation2 + $0x264] ss:$16 sps:$4 sm:$0xff]   ;;  %v2470_v19 = vld [vmem:[#allocation2 + $0x260] ss:$16 sps:$4 sm:$0xff]  }
  0x17   :  { %1269 = vmatpush1.bf16.msra.mxu0 %v2457_v10  ;;  %v2471_v20 = vld [vmem:[#allocation2 + $0x44] ss:$16 sps:$4 sm:$0xff]   ;;  %v2475_v22 = vld [vmem:[#allocation2 + $0x40] ss:$16 sps:$4 sm:$0xff]  }
  0x18   :  { %1312 = vmatpush1.bf16.msra.mxu1 %v2458_v11  ;;  %1270 = vmatprep.subr.bf16.mxu0 %v2459_v12  ;;  %v2473_v21 = vld [vmem:[#allocation2 + $0x244] ss:$16 sps:$4 sm:$0xff]   ;;  %v2476_v23 = vld [vmem:[#allocation2 + $0x240] ss:$16 sps:$4 sm:$0xff]  }
  0x19   :  { %1313 = vmatprep.subr.bf16.mxu1 %v2461_v13  ;;  %v2477_v24 = vld [vmem:[#allocation2 + $0x24] ss:$16 sps:$4 sm:$0xff]   ;;  %v2481_v26 = vld [vmem:[#allocation2 + $0x20] ss:$16 sps:$4 sm:$0xff]  }
  0x1a   :  { %v2479_v25 = vld [vmem:[#allocation2 + $0x224] ss:$16 sps:$4 sm:$0xff]   ;;  %v2482_v27 = vld [vmem:[#allocation2 + $0x220] ss:$16 sps:$4 sm:$0xff]  }
  0x1b   :  { %1271 = vmatpush1.bf16.msra.mxu0 %v2463_v14  ;;  %v2483_v28 = vld [vmem:[#allocation2 + $0x4] ss:$16 sps:$4 sm:$0xff]   ;;  %v2487_v30 = vld [vmem:[#allocation2] ss:$16 sps:$4 sm:$0xff]  }
  0x1c   :  { %1314 = vmatpush1.bf16.msra.mxu1 %v2464_v15  ;;  %1272 = vmatprep.subr.bf16.mxu0 %v2465_v16  ;;  %v2485_v29 = vld [vmem:[#allocation2 + $0x204] ss:$16 sps:$4 sm:$0xff]   ;;  %v2488_v31 = vld [vmem:[#allocation2 + $0x200] ss:$16 sps:$4 sm:$0xff]  }
  0x1d   :  { %1315 = vmatprep.subr.bf16.mxu1 %v2467_v17  ;;  %v2489_v32 = vld [vmem:[#allocation2 + $0x1e4] ss:$16 sps:$4 sm:$0xff]   ;;  %v2493_v34 = vld [vmem:[#allocation2 + $0x1e0] ss:$16 sps:$4 sm:$0xff]   ;;  %v2548_v17 = vld [vmem:[#allocation2 + $0xec] ss:$16 sps:$4 sm:$0xff]  }
  0x1e   :  { %v2491_v33 = vld [vmem:[#allocation2 + $0x3e4] ss:$16 sps:$4 sm:$0xff]   ;;  %v2494_v35 = vld [vmem:[#allocation2 + $0x3e0] ss:$16 sps:$4 sm:$0xff]  }
  0x1f   :  { %1273 = vmatpush1.bf16.msra.mxu0 %v2469_v18  ;;  %v2495_v36 = vld [vmem:[#allocation2 + $0x1c4] ss:$16 sps:$4 sm:$0xff]   ;;  %v2499_v38 = vld [vmem:[#allocation2 + $0x1c0] ss:$16 sps:$4 sm:$0xff]  }
  0x20   :  { %1316 = vmatpush1.bf16.msra.mxu1 %v2470_v19  ;;  %1274 = vmatprep.subr.bf16.mxu0 %v2471_v20  ;;  %v2497_v37 = vld [vmem:[#allocation2 + $0x3c4] ss:$16 sps:$4 sm:$0xff]   ;;  %v2500_v39 = vld [vmem:[#allocation2 + $0x3c0] ss:$16 sps:$4 sm:$0xff]   ;;  %v54_v20 = vld [vmem:[%s3060_s0 + $0x68] sm:$0xff] }
  0x21   :  { %1317 = vmatprep.subr.bf16.mxu1 %v2473_v21  ;;  %v2501_v40 = vld [vmem:[#allocation2 + $0x1a4] ss:$16 sps:$4 sm:$0xff]   ;;  %v2505_v42 = vld [vmem:[#allocation2 + $0x1a0] ss:$16 sps:$4 sm:$0xff]   ;;  %v2808_v21 = vmov 0  }
  0x22   :  { %v2503_v41 = vld [vmem:[#allocation2 + $0x3a4] ss:$16 sps:$4 sm:$0xff]   ;;  %v2506_v43 = vld [vmem:[#allocation2 + $0x3a0] ss:$16 sps:$4 sm:$0xff]  }
  0x23   :  { %1275 = vmatpush1.bf16.msra.mxu0 %v2475_v22  ;;  %v2507_v44 = vld [vmem:[#allocation2 + $0x184] ss:$16 sps:$4 sm:$0xff]   ;;  %v2511_v50 = vld [vmem:[#allocation2 + $0x180] ss:$16 sps:$4 sm:$0xff]  }
  0x24   :  { %1318 = vmatpush1.bf16.msra.mxu1 %v2476_v23  ;;  %1276 = vmatprep.subr.bf16.mxu0 %v2477_v24  ;;  %v2509_v45 = vld [vmem:[#allocation2 + $0x384] ss:$16 sps:$4 sm:$0xff]   ;;  %v2512_v51 = vld [vmem:[#allocation2 + $0x380] ss:$16 sps:$4 sm:$0xff]   ;;  %v2546_v24 = vld [vmem:[#allocation2 + $0xe8] ss:$16 sps:$4 sm:$0xff]  }
  0x25   :  { %1319 = vmatprep.subr.bf16.mxu1 %v2479_v25  ;;  %v49_v47 = vld [vmem:[%s3060_s0 + $0x40] sm:$0xff]  ;;  %v51_v49 = vld [vmem:[%s3060_s0 + $0x50] sm:$0xff] }
  0x26   :  { %v2513_v52 = vld [vmem:[#allocation2 + $0x164] ss:$16 sps:$4 sm:$0xff]   ;;  %v2866_v53 = vpack.c.bf16 %v49_v47, %v42_v46  ;;  %v2868_v54 = vpack.c.bf16 %v51_v49, %v44_v48  ;;  %v2517_v56 = vld [vmem:[#allocation2 + $0x160] ss:$16 sps:$4 sm:$0xff]   ;;  %v2576_v47 = vld [vmem:[#allocation2 + $0x48] ss:$16 sps:$4 sm:$0xff]  }
  0x27   :  { %1277 = vmatpush1.bf16.msra.mxu0 %v2481_v26  ;;  %v2515_v55 = vld [vmem:[#allocation2 + $0x364] ss:$16 sps:$4 sm:$0xff]   ;;  %v2518_v57 = vld [vmem:[#allocation2 + $0x360] ss:$16 sps:$4 sm:$0xff]   ;;  %v2554_v26 = vld [vmem:[#allocation2 + $0xcc] ss:$16 sps:$4 sm:$0xff]  }
  0x28   :  { %1320 = vmatpush1.bf16.msra.mxu1 %v2482_v27  ;;  %1278 = vmatprep.subr.bf16.mxu0 %v2483_v28  ;;  %v2519_v58 = vld [vmem:[#allocation2 + $0x144] ss:$16 sps:$4 sm:$0xff]   ;;  %v2523_v60 = vld [vmem:[#allocation2 + $0x140] ss:$16 sps:$4 sm:$0xff]   ;;  %v2552_v28 = vld [vmem:[#allocation2 + $0xc8] ss:$16 sps:$4 sm:$0xff]  }
  0x29   :  { %1321 = vmatprep.subr.bf16.mxu1 %v2485_v29  ;;  %1296 = vmatprep.mubr.bf16.mxu0 %v2866_v53  ;;  %v2521_v59 = vld [vmem:[#allocation2 + $0x344] ss:$16 sps:$4 sm:$0xff]   ;;  %v2524_v61 = vld [vmem:[#allocation2 + $0x340] ss:$16 sps:$4 sm:$0xff]   ;;  %v2584_v49 = vld [vmem:[#allocation2 + $0x2c] ss:$16 sps:$4 sm:$0xff]  }
  0x2a   :  { %1339 = vmatprep.mubr.bf16.mxu1 %v2868_v54  ;;  %v2525_v62 = vld [vmem:[#allocation2 + $0x124] ss:$16 sps:$4 sm:$0xff]   ;;  %v2529_v0 = vld [vmem:[#allocation2 + $0x120] ss:$16 sps:$4 sm:$0xff]  }
  0x2b   :  { %1279 = vmatpush1.bf16.msra.mxu0 %v2487_v30  ;;  %v2527_v63 = vld [vmem:[#allocation2 + $0x324] ss:$16 sps:$4 sm:$0xff]   ;;  %v2530_v1 = vld [vmem:[#allocation2 + $0x320] ss:$16 sps:$4 sm:$0xff]   ;;  %v2560_v30 = vld [vmem:[#allocation2 + $0xac] ss:$16 sps:$4 sm:$0xff]  }
  0x2c   :  { %1322 = vmatpush1.bf16.msra.mxu1 %v2488_v31  ;;  %1280 = vmatprep.subr.bf16.mxu0 %v2489_v32  ;;  %v2531_v2 = vld [vmem:[#allocation2 + $0x104] ss:$16 sps:$4 sm:$0xff]   ;;  %v2535_v4 = vld [vmem:[#allocation2 + $0x100] ss:$16 sps:$4 sm:$0xff]   ;;  %v2558_v32 = vld [vmem:[#allocation2 + $0xa8] ss:$16 sps:$4 sm:$0xff]  }
  0x2d   :  { %1323 = vmatprep.subr.bf16.mxu1 %v2491_v33  ;;  %v2533_v3 = vld [vmem:[#allocation2 + $0x304] ss:$16 sps:$4 sm:$0xff]   ;;  %v2536_v5 = vld [vmem:[#allocation2 + $0x300] ss:$16 sps:$4 sm:$0xff]  }
  0x2e   :  { %v41_v6 = vld [vmem:[%s3060_s0] sm:$0xff]  ;;  %v43_v8 = vld [vmem:[%s3060_s0 + $0x10] sm:$0xff] }
  0x2f   :  { %1281 = vmatpush2.bf16.msra.mxu0 %v2493_v34  ;;  %v2539_v10 = vld [vmem:[#allocation2 + $0x4e4] ss:$16 sps:$4 sm:$0xff]   ;;  %v2884_v12 = vpack.c.bf16 %v48_v7, %v41_v6  ;;  %v2886_v13 = vpack.c.bf16 %v50_v9, %v43_v8  ;;  %v2537_v14 = vld [vmem:[#allocation2 + $0x4e0] ss:$16 sps:$4 sm:$0xff]   ;;  %v2566_v34 = vld [vmem:[#allocation2 + $0x8c] ss:$16 sps:$4 sm:$0xff]  }
  0x30   :  { %1324 = vmatpush2.bf16.msra.mxu1 %v2494_v35  ;;  %1282 = vmatprep.subr.bf16.mxu0 %v2495_v36  ;;  %v2542_v11 = vld [vmem:[#allocation2 + $0x604] ss:$16 sps:$4 sm:$0xff]   ;;  %v2540_v15 = vld [vmem:[#allocation2 + $0x600] ss:$16 sps:$4 sm:$0xff]   ;;  %v2564_v36 = vld [vmem:[#allocation2 + $0x88] ss:$16 sps:$4 sm:$0xff]  }
  0x31   :  { %1325 = vmatprep.subr.bf16.mxu1 %v2497_v37  ;;  %v2545_v16 = vld [vmem:[#allocation2 + $0x4c4] ss:$16 sps:$4 sm:$0xff]   ;;  %v2543_v18 = vld [vmem:[#allocation2 + $0x4c0] ss:$16 sps:$4 sm:$0xff]   ;;  %v2614_v6 = vld [vmem:[#allocation2 + $0x18c] ss:$16 sps:$4 sm:$0xff]  }
  0x32   :  { %v47_v19 = vld [vmem:[%s3060_s0 + $0x30] sm:$0xff]  ;;  %v2612_v8 = vld [vmem:[#allocation2 + $0x188] ss:$16 sps:$4 sm:$0xff]  }
  0x33   :  { %1283 = vmatpush2.bf16.msra.mxu0 %v2499_v38  ;;  %v2551_v22 = vld [vmem:[#allocation2 + $0x4a4] ss:$16 sps:$4 sm:$0xff]   ;;  %v2897_v23 = vpack.c.bf16 %v54_v20, %v47_v19  ;;  %v2549_v25 = vld [vmem:[#allocation2 + $0x4a0] ss:$16 sps:$4 sm:$0xff]   ;;  %v2572_v38 = vld [vmem:[#allocation2 + $0x6c] ss:$16 sps:$4 sm:$0xff]  }
  0x34   :  { %1326 = vmatpush2.bf16.msra.mxu1 %v2500_v39  ;;  %1284 = vmatprep.subr.bf16.mxu0 %v2501_v40  ;;  %v2557_v27 = vld [vmem:[#allocation2 + $0x484] ss:$16 sps:$4 sm:$0xff]   ;;  %v2555_v29 = vld [vmem:[#allocation2 + $0x480] ss:$16 sps:$4 sm:$0xff]   ;;  %v2570_v40 = vld [vmem:[#allocation2 + $0x68] ss:$16 sps:$4 sm:$0xff]  }
  0x35   :  { %1327 = vmatprep.subr.bf16.mxu1 %v2503_v41  ;;  %v2563_v31 = vld [vmem:[#allocation2 + $0x464] ss:$16 sps:$4 sm:$0xff]   ;;  %v2561_v33 = vld [vmem:[#allocation2 + $0x460] ss:$16 sps:$4 sm:$0xff]   ;;  %v46_v41 = vld [vmem:[%s3060_s0 + $0x28] sm:$0xff] }
  0x36   :  { %v2569_v35 = vld [vmem:[#allocation2 + $0x444] ss:$16 sps:$4 sm:$0xff]   ;;  %v2567_v37 = vld [vmem:[#allocation2 + $0x440] ss:$16 sps:$4 sm:$0xff]  }
  0x37   :  { %1285 = vmatpush2.bf16.msra.mxu0 %v2505_v42  ;;  %v2575_v39 = vld [vmem:[#allocation2 + $0x424] ss:$16 sps:$4 sm:$0xff]   ;;  %v2579_v48 = vld [vmem:[#allocation2 + $0x400] ss:$16 sps:$4 sm:$0xff]  }
  0x38   :  { %1328 = vmatpush2.bf16.msra.mxu1 %v2506_v43  ;;  %1286 = vmatprep.subr.bf16.mxu0 %v2507_v44  ;;  %v53_v42 = vld [vmem:[%s3060_s0 + $0x60] sm:$0xff] }
  0x39   :  { %1329 = vmatprep.subr.bf16.mxu1 %v2509_v45  ;;  %v2573_v43 = vld [vmem:[#allocation2 + $0x420] ss:$16 sps:$4 sm:$0xff]   ;;  %v2908_v44 = vpack.c.bf16 %v53_v42, %v46_v41  ;;  %v2578_v45 = vld [vmem:[#allocation2 + $0x4c] ss:$16 sps:$4 sm:$0xff]   ;;  %v2581_v46 = vld [vmem:[#allocation2 + $0x404] ss:$16 sps:$4 sm:$0xff]  }
  0x3a   :  { %v2617_v7 = vld [vmem:[#allocation2 + $0x544] ss:$16 sps:$4 sm:$0xff]   ;;  %v2615_v9 = vld [vmem:[#allocation2 + $0x540] ss:$16 sps:$4 sm:$0xff]   ;;  %v2656_v41 = vld [vmem:[#allocation2 + $0x4ac] ss:$16 sps:$4 sm:$0xff]  }
  0x3b   :  { %1287 = vmatpush2.bf16.msra.mxu0 %v2511_v50  ;;  %v2587_v50 = vld [vmem:[#allocation2 + $0x5e4] ss:$16 sps:$4 sm:$0xff]   ;;  %v2627_v19 = vld [vmem:[#allocation2 + $0x500] ss:$16 sps:$4 sm:$0xff]   ;;  %v2659_v42 = vld [vmem:[#allocation2 + $0x26c] ss:$16 sps:$4 sm:$0xff]  }
  0x3c   :  { %1330 = vmatpush2.bf16.msra.mxu1 %v2512_v51  ;;  %1288 = vmatprep.subr.bf16.mxu0 %v2513_v52  ;;  %v2582_v51 = vld [vmem:[#allocation2 + $0x28] ss:$16 sps:$4 sm:$0xff]   ;;  %v2585_v52 = vld [vmem:[#allocation2 + $0x5e0] ss:$16 sps:$4 sm:$0xff]  }
  0x3d   :  { %1331 = vmatprep.subr.bf16.mxu1 %v2515_v55  ;;  %v2593_v55 = vld [vmem:[#allocation2 + $0x5c4] ss:$16 sps:$4 sm:$0xff]  }
  0x3e   :  { %v45_v20 = vld [vmem:[%s3060_s0 + $0x20] sm:$0xff] }
  0x3f   :  { %1289 = vmatpush2.bf16.msra.mxu0 %v2517_v56  ;;  %v2588_v56 = vld [vmem:[#allocation2 + $0x8] ss:$16 sps:$4 sm:$0xff]  }
  0x40   :  { %1332 = vmatpush2.bf16.msra.mxu1 %v2518_v57  ;;  %1290 = vmatprep.subr.bf16.mxu0 %v2519_v58  ;;  %v2591_v57 = vld [vmem:[#allocation2 + $0x5c0] ss:$16 sps:$4 sm:$0xff]   ;;  %v2596_v58 = vld [vmem:[#allocation2 + $0x1ec] ss:$16 sps:$4 sm:$0xff]  }
  0x41   :  { %1333 = vmatprep.subr.bf16.mxu1 %v2521_v59  ;;  %v2599_v59 = vld [vmem:[#allocation2 + $0x5a4] ss:$16 sps:$4 sm:$0xff]  }
  0x43   :  { %1291 = vmatpush2.bf16.msra.mxu0 %v2523_v60  ;;  %v2594_v60 = vld [vmem:[#allocation2 + $0x1e8] ss:$16 sps:$4 sm:$0xff]  }
  0x44   :  { %1334 = vmatpush2.bf16.msra.mxu1 %v2524_v61  ;;  %1292 = vmatprep.subr.bf16.mxu0 %v2525_v62  ;;  %v2597_v61 = vld [vmem:[#allocation2 + $0x5a0] ss:$16 sps:$4 sm:$0xff]   ;;  %v2602_v62 = vld [vmem:[#allocation2 + $0x1cc] ss:$16 sps:$4 sm:$0xff]  }
  0x45   :  { %1335 = vmatprep.subr.bf16.mxu1 %v2527_v63  ;;  %v2605_v63 = vld [vmem:[#allocation2 + $0x584] ss:$16 sps:$4 sm:$0xff]  }
  0x47   :  { %1293 = vmatpush2.bf16.msra.mxu0 %v2529_v0  ;;  %v2600_v0 = vld [vmem:[#allocation2 + $0x1c8] ss:$16 sps:$4 sm:$0xff]  }
  0x48   :  { %1336 = vmatpush2.bf16.msra.mxu1 %v2530_v1  ;;  %1294 = vmatprep.subr.bf16.mxu0 %v2531_v2  ;;  %v2603_v1 = vld [vmem:[#allocation2 + $0x580] ss:$16 sps:$4 sm:$0xff]   ;;  %v2608_v2 = vld [vmem:[#allocation2 + $0x1ac] ss:$16 sps:$4 sm:$0xff]  }
  0x49   :  { %1337 = vmatprep.subr.bf16.mxu1 %v2533_v3  ;;  %v2611_v3 = vld [vmem:[#allocation2 + $0x564] ss:$16 sps:$4 sm:$0xff]  }
  0x4b   :  { %1295 = vmatpush2.bf16.msra.mxu0 %v2535_v4  ;;  %v2606_v4 = vld [vmem:[#allocation2 + $0x1a8] ss:$16 sps:$4 sm:$0xff]  }
  0x4c   :  { %1338 = vmatpush2.bf16.msra.mxu1 %v2536_v5  ;;  %1350 = vmatprep.subr.bf16.mxu0 %v2539_v10  ;;  %v2609_v5 = vld [vmem:[#allocation2 + $0x560] ss:$16 sps:$4 sm:$0xff]   ;;  %v2620_v10 = vld [vmem:[#allocation2 + $0x16c] ss:$16 sps:$4 sm:$0xff]  }
  0x4d   :  { %1407 = vmatprep.subr.bf16.mxu1 %v2542_v11  ;;  %v2623_v11 = vld [vmem:[#allocation2 + $0x524] ss:$16 sps:$4 sm:$0xff]  }
  0x4e   :  { %1297 = vmatmul.mubr.bf16.vlgmr.msra.gmra.mxu0 %v2884_v12 }
  0x4f   :  { %1340 = vmatmul.mubr.bf16.vlgmr.msra.gmra.mxu1 %v2886_v13  ;;  %1351 = vmatpush1.bf16.msra.mxu0 %v2537_v14  ;;  %v2618_v14 = vld [vmem:[#allocation2 + $0x168] ss:$16 sps:$4 sm:$0xff]  }
  0x50   :  { %1408 = vmatpush1.bf16.msra.mxu1 %v2540_v15  ;;  %1352 = vmatprep.subr.bf16.mxu0 %v2545_v16  ;;  %v2621_v15 = vld [vmem:[#allocation2 + $0x520] ss:$16 sps:$4 sm:$0xff]   ;;  %v2626_v16 = vld [vmem:[#allocation2 + $0x14c] ss:$16 sps:$4 sm:$0xff]  }
  0x51   :  { %1425 = vmatprep.mubr.bf16.mxu1 %v2808_v21  ;;  %1436 = vmatprep.subr.bf16.mxu1 %v2548_v17  ;;  %v2629_v17 = vld [vmem:[#allocation2 + $0x504] ss:$16 sps:$4 sm:$0xff]  }
  0x52   :  { %1382 = vmatprep.mubr.bf16.mxu0 %v2908_v44 }
  0x53   :  { %1353 = vmatpush1.bf16.msra.mxu0 %v2543_v18  ;;  %v2624_v18 = vld [vmem:[#allocation2 + $0x148] ss:$16 sps:$4 sm:$0xff]  }
  0x54   :  { %1354 = vmatprep.subr.bf16.mxu0 %v2551_v22  ;;  %v52_v22 = vld [vmem:[%s3060_s0 + $0x58] sm:$0xff] }
  0x57   :  { %2309 = vmatmul.mubr.msk.bf16.vlgmr.msra.gmra.mxu1 %vm1260_vm0, %v2897_v23  ;;  %1355 = vmatpush1.bf16.msra.mxu0 %v2549_v25  ;;  %v2635_v25 = vld [vmem:[#allocation2 + $0x2ec] ss:$16 sps:$4 sm:$0xff]  }
  0x58   :  { %1437 = vmatpush1.bf16.msra.mxu1 %v2546_v24  ;;  %1356 = vmatprep.subr.bf16.mxu0 %v2557_v27  ;;  %v2632_v24 = vld [vmem:[#allocation2 + $0x12c] ss:$16 sps:$4 sm:$0xff]   ;;  %v2630_v27 = vld [vmem:[#allocation2 + $0x128] ss:$16 sps:$4 sm:$0xff]  }
  0x59   :  { %1438 = vmatprep.subr.bf16.mxu1 %v2554_v26  ;;  %1468 = vmatprep.mubr.bf16.mxu1 %v2866_v53  ;;  %v2590_v53 = vld [vmem:[#allocation2 + $0xc] ss:$16 sps:$4 sm:$0xff]   ;;  %v2917_v26 = vpack.c.bf16 %v52_v22, %v45_v20  ;;  %v2714_v20 = vld [vmem:[#allocation2 + $0x568] ss:$16 sps:$4 sm:$0xff]  }
  0x5a   :  { %v2717_v22 = vld [vmem:[#allocation2 + $0x328] ss:$16 sps:$4 sm:$0xff]  }
  0x5b   :  { %1357 = vmatpush1.bf16.msra.mxu0 %v2555_v29  ;;  %v2638_v29 = vld [vmem:[#allocation2 + $0x10c] ss:$16 sps:$4 sm:$0xff]  }
  0x5c   :  { %1439 = vmatpush1.bf16.msra.mxu1 %v2552_v28  ;;  %1358 = vmatprep.subr.bf16.mxu0 %v2563_v31  ;;  %v2633_v28 = vld [vmem:[#allocation2 + $0x2e8] ss:$16 sps:$4 sm:$0xff]  }
  0x5d   :  { %1440 = vmatprep.subr.bf16.mxu1 %v2560_v30  ;;  %v2641_v30 = vld [vmem:[#allocation2 + $0x2cc] ss:$16 sps:$4 sm:$0xff]   ;;  %v2636_v31 = vld [vmem:[#allocation2 + $0x108] ss:$16 sps:$4 sm:$0xff]  }
  0x5f   :  { %1359 = vmatpush1.bf16.msra.mxu0 %v2561_v33  ;;  %v2644_v33 = vld [vmem:[#allocation2 + $0x4ec] ss:$16 sps:$4 sm:$0xff]  }
  0x60   :  { %1441 = vmatpush1.bf16.msra.mxu1 %v2558_v32  ;;  %1360 = vmatprep.subr.bf16.mxu0 %v2569_v35  ;;  %v2639_v32 = vld [vmem:[#allocation2 + $0x2c8] ss:$16 sps:$4 sm:$0xff]  }
  0x61   :  { %1442 = vmatprep.subr.bf16.mxu1 %v2566_v34  ;;  %v2647_v34 = vld [vmem:[#allocation2 + $0x2ac] ss:$16 sps:$4 sm:$0xff]   ;;  %v2642_v35 = vld [vmem:[#allocation2 + $0x4e8] ss:$16 sps:$4 sm:$0xff]  }
  0x63   :  { %1361 = vmatpush1.bf16.msra.mxu0 %v2567_v37  ;;  %v2650_v37 = vld [vmem:[#allocation2 + $0x4cc] ss:$16 sps:$4 sm:$0xff]  }
  0x64   :  { %1443 = vmatpush1.bf16.msra.mxu1 %v2564_v36  ;;  %1362 = vmatprep.subr.bf16.mxu0 %v2575_v39  ;;  %v2645_v36 = vld [vmem:[#allocation2 + $0x2a8] ss:$16 sps:$4 sm:$0xff]  }
  0x65   :  { %1444 = vmatprep.subr.bf16.mxu1 %v2572_v38  ;;  %v2653_v38 = vld [vmem:[#allocation2 + $0x28c] ss:$16 sps:$4 sm:$0xff]   ;;  %v2648_v39 = vld [vmem:[#allocation2 + $0x4c8] ss:$16 sps:$4 sm:$0xff]  }
  0x67   :  { %1363 = vmatpush1.bf16.msra.mxu0 %v2573_v43  ;;  %v2654_v43 = vld [vmem:[#allocation2 + $0x4a8] ss:$16 sps:$4 sm:$0xff]  }
  0x68   :  { %1445 = vmatpush1.bf16.msra.mxu1 %v2570_v40  ;;  %1364 = vmatprep.subr.bf16.mxu0 %v2581_v46  ;;  %v2651_v40 = vld [vmem:[#allocation2 + $0x288] ss:$16 sps:$4 sm:$0xff]   ;;  %v2665_v46 = vld [vmem:[#allocation2 + $0x24c] ss:$16 sps:$4 sm:$0xff]  }
  0x69   :  { %1446 = vmatprep.subr.bf16.mxu1 %v2578_v45  ;;  %v2657_v45 = vld [vmem:[#allocation2 + $0x268] ss:$16 sps:$4 sm:$0xff]  }
  0x6b   :  { %1365 = vmatpush1.bf16.msra.mxu0 %v2579_v48  ;;  %v2663_v48 = vld [vmem:[#allocation2 + $0x248] ss:$16 sps:$4 sm:$0xff]  }
  0x6c   :  { %1447 = vmatpush1.bf16.msra.mxu1 %v2576_v47  ;;  %1366 = vmatprep.subr.bf16.mxu0 %v2587_v50  ;;  %v2660_v47 = vld [vmem:[#allocation2 + $0x488] ss:$16 sps:$4 sm:$0xff]  }
  0x6d   :  { %1448 = vmatprep.subr.bf16.mxu1 %v2584_v49  ;;  %v2668_v49 = vld [vmem:[#allocation2 + $0x46c] ss:$16 sps:$4 sm:$0xff]   ;;  %v2666_v50 = vld [vmem:[#allocation2 + $0x468] ss:$16 sps:$4 sm:$0xff]  }
  0x6f   :  { %1367 = vmatpush2.bf16.msra.mxu0 %v2585_v52  ;;  %v2674_v52 = vld [vmem:[#allocation2 + $0x44c] ss:$16 sps:$4 sm:$0xff]  }
  0x70   :  { %1449 = vmatpush1.bf16.msra.mxu1 %v2582_v51  ;;  %1368 = vmatprep.subr.bf16.mxu0 %v2593_v55  ;;  %v2669_v51 = vld [vmem:[#allocation2 + $0x228] ss:$16 sps:$4 sm:$0xff]  }
  0x71   :  { %1450 = vmatprep.subr.bf16.mxu1 %v2590_v53  ;;  %v2677_v53 = vld [vmem:[#allocation2 + $0x20c] ss:$16 sps:$4 sm:$0xff]   ;;  %v2675_v55 = vld [vmem:[#allocation2 + $0x208] ss:$16 sps:$4 sm:$0xff]  }
  0x73   :  { %1369 = vmatpush2.bf16.msra.mxu0 %v2591_v57  ;;  %v2683_v57 = vld [vmem:[#allocation2 + $0x3ec] ss:$16 sps:$4 sm:$0xff]  }
  0x74   :  { %1451 = vmatpush1.bf16.msra.mxu1 %v2588_v56  ;;  %1370 = vmatprep.subr.bf16.mxu0 %v2599_v59  ;;  %v2680_v56 = vld [vmem:[#allocation2 + $0x42c] ss:$16 sps:$4 sm:$0xff]   ;;  %v2681_v59 = vld [vmem:[#allocation2 + $0x3e8] ss:$16 sps:$4 sm:$0xff]  }
  0x75   :  { %1452 = vmatprep.subr.bf16.mxu1 %v2596_v58  ;;  %v2678_v58 = vld [vmem:[#allocation2 + $0x428] ss:$16 sps:$4 sm:$0xff]  }
  0x77   :  { %1371 = vmatpush2.bf16.msra.mxu0 %v2597_v61  ;;  %v2689_v61 = vld [vmem:[#allocation2 + $0x3cc] ss:$16 sps:$4 sm:$0xff]  }
  0x78   :  { %1453 = vmatpush2.bf16.msra.mxu1 %v2594_v60  ;;  %1372 = vmatprep.subr.bf16.mxu0 %v2605_v63  ;;  %v2686_v60 = vld [vmem:[#allocation2 + $0x40c] ss:$16 sps:$4 sm:$0xff]   ;;  %v2687_v63 = vld [vmem:[#allocation2 + $0x3c8] ss:$16 sps:$4 sm:$0xff]  }
  0x79   :  { %1454 = vmatprep.subr.bf16.mxu1 %v2602_v62  ;;  %v2684_v62 = vld [vmem:[#allocation2 + $0x408] ss:$16 sps:$4 sm:$0xff]  }
  0x7b   :  { %1373 = vmatpush2.bf16.msra.mxu0 %v2603_v1  ;;  %v2695_v1 = vld [vmem:[#allocation2 + $0x3ac] ss:$16 sps:$4 sm:$0xff]  }
  0x7c   :  { %1455 = vmatpush2.bf16.msra.mxu1 %v2600_v0  ;;  %1374 = vmatprep.subr.bf16.mxu0 %v2611_v3  ;;  %v2692_v0 = vld [vmem:[#allocation2 + $0x5ec] ss:$16 sps:$4 sm:$0xff]   ;;  %v2693_v3 = vld [vmem:[#allocation2 + $0x3a8] ss:$16 sps:$4 sm:$0xff]  }
  0x7d   :  { %1456 = vmatprep.subr.bf16.mxu1 %v2608_v2  ;;  %v2690_v2 = vld [vmem:[#allocation2 + $0x5e8] ss:$16 sps:$4 sm:$0xff]  }
  0x7f   :  { %1375 = vmatpush2.bf16.msra.mxu0 %v2609_v5  ;;  %v2701_v5 = vld [vmem:[#allocation2 + $0x38c] ss:$16 sps:$4 sm:$0xff]  }
  0x80   :  { %1457 = vmatpush2.bf16.msra.mxu1 %v2606_v4  ;;  %1376 = vmatprep.subr.bf16.mxu0 %v2617_v7  ;;  %v2698_v4 = vld [vmem:[#allocation2 + $0x5cc] ss:$16 sps:$4 sm:$0xff]   ;;  %v2699_v7 = vld [vmem:[#allocation2 + $0x388] ss:$16 sps:$4 sm:$0xff]  }
  0x81   :  { %1458 = vmatprep.subr.bf16.mxu1 %v2614_v6  ;;  %v2696_v6 = vld [vmem:[#allocation2 + $0x5c8] ss:$16 sps:$4 sm:$0xff]  }
  0x83   :  { %1377 = vmatpush2.bf16.msra.mxu0 %v2615_v9  ;;  %v2707_v9 = vld [vmem:[#allocation2 + $0x36c] ss:$16 sps:$4 sm:$0xff]  }
  0x84   :  { %1459 = vmatpush2.bf16.msra.mxu1 %v2612_v8  ;;  %1378 = vmatprep.subr.bf16.mxu0 %v2623_v11  ;;  %v2704_v8 = vld [vmem:[#allocation2 + $0x5ac] ss:$16 sps:$4 sm:$0xff]   ;;  %v2705_v11 = vld [vmem:[#allocation2 + $0x368] ss:$16 sps:$4 sm:$0xff]  }
  0x85   :  { %1460 = vmatprep.subr.bf16.mxu1 %v2620_v10  ;;  %v2702_v10 = vld [vmem:[#allocation2 + $0x5a8] ss:$16 sps:$4 sm:$0xff]  }
  0x87   :  { %1379 = vmatpush2.bf16.msra.mxu0 %v2621_v15  ;;  %v2713_v15 = vld [vmem:[#allocation2 + $0x34c] ss:$16 sps:$4 sm:$0xff]  }
  0x88   :  { %1461 = vmatpush2.bf16.msra.mxu1 %v2618_v14  ;;  %1380 = vmatprep.subr.bf16.mxu0 %v2629_v17  ;;  %v2710_v14 = vld [vmem:[#allocation2 + $0x58c] ss:$16 sps:$4 sm:$0xff]   ;;  %v2711_v17 = vld [vmem:[#allocation2 + $0x348] ss:$16 sps:$4 sm:$0xff]  }
  0x89   :  { %1462 = vmatprep.subr.bf16.mxu1 %v2626_v16  ;;  %v2708_v16 = vld [vmem:[#allocation2 + $0x588] ss:$16 sps:$4 sm:$0xff]  }
  0x8b   :  { %1381 = vmatpush2.bf16.msra.mxu0 %v2627_v19  ;;  %v2719_v19 = vld [vmem:[#allocation2 + $0x32c] ss:$16 sps:$4 sm:$0xff]  }
  0x8c   :  { %1463 = vmatpush2.bf16.msra.mxu1 %v2624_v18  ;;  %1479 = vmatprep.subr.bf16.mxu0 %v2635_v25  ;;  %v2716_v18 = vld [vmem:[#allocation2 + $0x56c] ss:$16 sps:$4 sm:$0xff]  }
  0x8d   :  { %1464 = vmatprep.subr.bf16.mxu1 %v2632_v24  ;;  %v2722_v24 = vld [vmem:[#allocation2 + $0x54c] ss:$16 sps:$4 sm:$0xff]  }
  0x8e   :  { %1383 = vmatmul.mubr.bf16.vlgmr.msra.gmra.mxu0 %v2917_v26  ;;  %v2725_v25 = vld [vmem:[#allocation2 + $0x30c] ss:$16 sps:$4 sm:$0xff]  }
  0x8f   :  { %1480 = vmatpush1.bf16.msra.mxu0 %v2633_v28  ;;  %1511 = vmatprep.mubr.bf16.mxu0 %v2868_v54  ;;  %v2662_v54 = vld [vmem:[#allocation2 + $0x48c] ss:$16 sps:$4 sm:$0xff]   ;;  %v2723_v28 = vld [vmem:[#allocation2 + $0x308] ss:$16 sps:$4 sm:$0xff]  }
  0x90   :  { %1465 = vmatpush2.bf16.msra.mxu1 %v2630_v27  ;;  %1481 = vmatprep.subr.bf16.mxu0 %v2641_v30  ;;  %v2720_v27 = vld [vmem:[#allocation2 + $0x548] ss:$16 sps:$4 sm:$0xff]  }
  0x91   :  { %1466 = vmatprep.subr.bf16.mxu1 %v2638_v29  ;;  %v2728_v29 = vld [vmem:[#allocation2 + $0x52c] ss:$16 sps:$4 sm:$0xff]  }
  0x92   :  { %v2735_v30 = vld [vmem:[%s3063_s3 + $0x78] sm:$0xff]  }
  0x93   :  { %1482 = vmatpush1.bf16.msra.mxu0 %v2639_v32  ;;  %v2736_v32 = vld [vmem:[%s3063_s3 + $0x38] sm:$0xff]  }
  0x94   :  { %1467 = vmatpush2.bf16.msra.mxu1 %v2636_v31  ;;  %1483 = vmatprep.subr.bf16.mxu0 %v2647_v34  ;;  %v2726_v31 = vld [vmem:[#allocation2 + $0x528] ss:$16 sps:$4 sm:$0xff]   ;;  %v2737_v34 = vld [vmem:[%s3063_s3 + $0x70] sm:$0xff]  }
  0x95   :  { %1522 = vmatprep.subr.bf16.mxu1 %v2644_v33  ;;  %v2731_v33 = vld [vmem:[#allocation2 + $0x50c] ss:$16 sps:$4 sm:$0xff]  }
  0x97   :  { %1469 = vmatmul.mubr.bf16.vlgmr.msra.gmra.mxu1 %v2884_v12  ;;  %1484 = vmatpush1.bf16.msra.mxu0 %v2645_v36  ;;  %v2671_v12 = vld [vmem:[#allocation2 + $0x22c] ss:$16 sps:$4 sm:$0xff]   ;;  %v2738_v36 = vld [vmem:[%s3063_s3 + $0x30] sm:$0xff]  }
  0x98   :  { %1523 = vmatpush1.bf16.msra.mxu1 %v2642_v35  ;;  %1485 = vmatprep.subr.bf16.mxu0 %v2653_v38  ;;  %v2729_v35 = vld [vmem:[#allocation2 + $0x508] ss:$16 sps:$4 sm:$0xff]  }
  0x99   :  { %1524 = vmatprep.subr.bf16.mxu1 %v2650_v37  ;;  %1554 = vmatprep.mubr.bf16.mxu1 %v2908_v44  ;;  %v2672_v44 = vld [vmem:[#allocation2 + $0x448] ss:$16 sps:$4 sm:$0xff]   ;;  %v2734_v37 = vld [vmem:[#allocation2 + $0x60c] ss:$16 sps:$4 sm:$0xff]  }
  0x9a   :  { %v2739_v38 = vld [vmem:[%s3063_s3 + $0x68] sm:$0xff]  }
  0x9b   :  { %1486 = vmatpush1.bf16.msra.mxu0 %v2651_v40  ;;  %v2741_v40 = vld [vmem:[%s3063_s3 + $0x60] sm:$0xff]  }
  0x9c   :  { %1525 = vmatpush1.bf16.msra.mxu1 %v2648_v39  ;;  %1487 = vmatprep.subr.bf16.mxu0 %v2659_v42  ;;  %v2732_v39 = vld [vmem:[#allocation2 + $0x608] ss:$16 sps:$4 sm:$0xff]  }
  0x9d   :  { %1526 = vmatprep.subr.bf16.mxu1 %v2656_v41  ;;  %v2742_v41 = vld [vmem:[%s3063_s3 + $0x20] sm:$0xff]   ;;  %v2743_v42 = vld [vmem:[%s3063_s3 + $0x58] sm:$0xff]  }
  0x9f   :  { %1488 = vmatpush1.bf16.msra.mxu0 %v2657_v45  ;;  %v2752_v45 = vld [vmem:[%s3063_s3 + $0xb8] sm:$0xff]  }
  0xa0   :  { %1527 = vmatpush1.bf16.msra.mxu1 %v2654_v43  ;;  %1489 = vmatprep.subr.bf16.mxu0 %v2665_v46  ;;  %v2744_v43 = vld [vmem:[%s3063_s3 + $0x18] sm:$0xff]   ;;  %v2747_v46 = vld [vmem:[%s3063_s3 + $0x48] sm:$0xff]  }
  0xa1   :  { %1528 = vmatprep.subr.bf16.mxu1 %v2662_v54  ;;  %v2746_v54 = vld [vmem:[%s3063_s3 + $0x10] sm:$0xff]  }
  0xa3   :  { %1490 = vmatpush1.bf16.msra.mxu0 %v2663_v48  ;;  %v2750_v48 = vld [vmem:[%s3063_s3] sm:$0xff]  }
  0xa4   :  { %1529 = vmatpush1.bf16.msra.mxu1 %v2660_v47  ;;  %1491 = vmatprep.subr.bf16.mxu0 %v2671_v12  ;;  %v2749_v47 = vld [vmem:[%s3063_s3 + $0x40] sm:$0xff]   ;;  %v2754_v12 = vld [vmem:[%s3063_s3 + $0xb0] sm:$0xff]  }
  0xa5   :  { %1530 = vmatprep.subr.bf16.mxu1 %v2668_v49  ;;  %v2753_v49 = vld [vmem:[%s3063_s3 + $0xf0] sm:$0xff]  }
  0xa7   :  { %1492 = vmatpush1.bf16.msra.mxu0 %v2669_v51  ;;  %v2756_v51 = vld [vmem:[%s3063_s3 + $0xa8] sm:$0xff]  }
  0xa8   :  { %1531 = vmatpush1.bf16.msra.mxu1 %v2666_v50  ;;  %1493 = vmatprep.subr.bf16.mxu0 %v2677_v53  ;;  %v2755_v50 = vld [vmem:[%s3063_s3 + $0xe8] sm:$0xff]   ;;  %v2758_v53 = vld [vmem:[%s3063_s3 + $0xa0] sm:$0xff]  }
  0xa9   :  { %1532 = vmatprep.subr.bf16.mxu1 %v2674_v52  ;;  %v2757_v52 = vld [vmem:[%s3063_s3 + $0xe0] sm:$0xff]  }
  0xab   :  { %1494 = vmatpush1.bf16.msra.mxu0 %v2675_v55  ;;  %v2760_v55 = vld [vmem:[%s3063_s3 + $0x98] sm:$0xff]  }
  0xac   :  { %1533 = vmatpush1.bf16.msra.mxu1 %v2672_v44  ;;  %1495 = vmatprep.subr.bf16.mxu0 %v2683_v57  ;;  %v2759_v44 = vld [vmem:[%s3063_s3 + $0xd8] sm:$0xff]   ;;  %v2762_v57 = vld [vmem:[%s3063_s3 + $0x90] sm:$0xff]  }
  0xad   :  { %1534 = vmatprep.subr.bf16.mxu1 %v2680_v56  ;;  %v2761_v56 = vld [vmem:[%s3063_s3 + $0xd0] sm:$0xff]  }
  0xaf   :  { %1496 = vmatpush2.bf16.msra.mxu0 %v2681_v59  ;;  %v2764_v59 = vld [vmem:[%s3063_s3 + $0x88] sm:$0xff]  }
  0xb0   :  { %1535 = vmatpush1.bf16.msra.mxu1 %v2678_v58  ;;  %1497 = vmatprep.subr.bf16.mxu0 %v2689_v61  ;;  %v2763_v58 = vld [vmem:[%s3063_s3 + $0xc8] sm:$0xff]   ;;  %v2766_v61 = vld [vmem:[%s3063_s3 + $0x80] sm:$0xff]  }
  0xb1   :  { %1536 = vmatprep.subr.bf16.mxu1 %v2686_v60  ;;  %v2765_v60 = vld [vmem:[%s3063_s3 + $0xc0] sm:$0xff]  }
  0xb3   :  { %1498 = vmatpush2.bf16.msra.mxu0 %v2687_v63  ;;  %v260_v63 = vlaneseq }
  0xb4   :  { %1537 = vmatpush1.bf16.msra.mxu1 %v2684_v62  ;;  %1499 = vmatprep.subr.bf16.mxu0 %v2695_v1 }
  0xb5   :  { %1538 = vmatprep.subr.bf16.mxu1 %v2692_v0  ;;  %v261_v1 = vshrl.u32 %v260_v63, 7 }
  0xb7   :  { %1500 = vmatpush2.bf16.msra.mxu0 %v2693_v3 }
  0xb8   :  { %1539 = vmatpush2.bf16.msra.mxu1 %v2690_v2  ;;  %1501 = vmatprep.subr.bf16.mxu0 %v2701_v5  ;;  %v262_v5 = vsub.s32 0, %v261_v1 }
  0xb9   :  { %1540 = vmatprep.subr.bf16.mxu1 %v2698_v4  ;;  %v266_v4 = vsub.s32 1, %v261_v1 }
  0xbb   :  { %1502 = vmatpush2.bf16.msra.mxu0 %v2699_v7  ;;  %v258_v7 = vld [vmem:[%s3062_s2] sm:$0xf] }
  0xbc   :  { %1541 = vmatpush2.bf16.msra.mxu1 %v2696_v6  ;;  %1503 = vmatprep.subr.bf16.mxu0 %v2707_v9  ;;  %v267_v9 = vrot.slane %v258_v7, %v266_v4 }
  0xbd   :  { %1542 = vmatprep.subr.bf16.mxu1 %v2704_v8 }
  0xbf   :  { %1504 = vmatpush2.bf16.msra.mxu0 %v2705_v11 }
  0xc0   :  { %1543 = vmatpush2.bf16.msra.mxu1 %v2702_v10  ;;  %1505 = vmatprep.subr.bf16.mxu0 %v2713_v15  ;;  %v263_v10 = vrot.slane %v258_v7, %v262_v5 }
  0xc1   :  { %1544 = vmatprep.subr.bf16.mxu1 %v2710_v14 }
  0xc3   :  { %1506 = vmatpush2.bf16.msra.mxu0 %v2711_v17 }
  0xc4   :  { %1545 = vmatpush2.bf16.msra.mxu1 %v2708_v16  ;;  %1507 = vmatprep.subr.bf16.mxu0 %v2719_v19 }
  0xc5   :  { %1546 = vmatprep.subr.bf16.mxu1 %v2716_v18 }
  0xc7   :  { %1508 = vmatpush2.bf16.msra.mxu0 %v2717_v22 }
  0xc8   :  { %1547 = vmatpush2.bf16.msra.mxu1 %v2714_v20  ;;  %1509 = vmatprep.subr.bf16.mxu0 %v2725_v25 }
  0xc9   :  { %1548 = vmatprep.subr.bf16.mxu1 %v2722_v24 }
  0xcb   :  { %1510 = vmatpush2.bf16.msra.mxu0 %v2723_v28 }
  0xcc   :  { %1549 = vmatpush2.bf16.msra.mxu1 %v2720_v27  ;;  %2362 = vmatprep.subr.bf16.mxu0 %v2735_v30 }
  0xcd   :  { %1550 = vmatprep.subr.bf16.mxu1 %v2728_v29 }
  0xce   :  { %1512 = vmatmul.mubr.bf16.vlgmr.msra.gmra.mxu0 %v2886_v13  ;;  %v2740_v13 = vld [vmem:[%s3063_s3 + $0x28] sm:$0xff]  }
  0xcf   :  { %2363 = vmatpush3.bf16.msra.mxu0 %v2736_v32 }
  0xd0   :  { %1551 = vmatpush2.bf16.msra.mxu1 %v2726_v31  ;;  %2364 = vmatprep.subr.bf16.mxu0 %v2737_v34 }
  0xd1   :  { %1552 = vmatprep.subr.bf16.mxu1 %v2731_v33 }
  0xd3   :  { %2365 = vmatpush3.bf16.msra.mxu0 %v2738_v36 }
  0xd4   :  { %1553 = vmatpush2.bf16.msra.mxu1 %v2729_v35  ;;  %2366 = vmatprep.subr.bf16.mxu0 %v2739_v38 }
  0xd5   :  { %1579 = vmatprep.subr.bf16.mxu1 %v2734_v37 }
  0xd7   :  { %1555 = vmatmul.mubr.bf16.vlgmr.msra.gmra.mxu1 %v2917_v26  ;;  %2367 = vmatpush3.bf16.msra.mxu0 %v2740_v13  ;;  %v2751_v26 = vld [vmem:[%s3063_s3 + $0xf8] sm:$0xff]  }
  0xd8   :  { %1580 = vmatpush1.bf16.msra.mxu1 %v2732_v39  ;;  %1597 = vmatprep.mubr.bf16.mxu1 %v2808_v21  ;;  %v2745_v21 = vld [vmem:[%s3063_s3 + $0x50] sm:$0xff]  }
  0xd9   :  { %2368 = vmatprep.subr.bf16.mxu0 %v2741_v40  ;;  %2384 = vmatprep.subr.bf16.mxu1 %v2751_v26 }
  0xdb   :  { %2369 = vmatpush3.bf16.msra.mxu0 %v2742_v41 }
  0xdc   :  { %2370 = vmatprep.subr.bf16.mxu0 %v2743_v42 }
  0xdf   :  { %2310 = vmatmul.mubr.msk.bf16.vlgmr.msra.gmra.mxu1 %vm1260_vm0, %v2897_v23  ;;  %2371 = vmatpush3.bf16.msra.mxu0 %v2744_v43  ;;  %v2748_v23 = vld [vmem:[%s3063_s3 + $0x8] sm:$0xff]  }
  0xe0   :  { %2372 = vmatprep.subr.bf16.mxu0 %v2745_v21  ;;  %2385 = vmatpush3.bf16.msra.mxu1 %v2752_v45 }
  0xe1   :  { %2386 = vmatprep.subr.bf16.mxu1 %v2753_v49  ;;  %v274_v49 = vsub.s32 3, %v261_v1 }
  0xe3   :  { %2373 = vmatpush3.bf16.msra.mxu0 %v2746_v54 }
  0xe4   :  { %2374 = vmatprep.subr.bf16.mxu0 %v2747_v46  ;;  %2387 = vmatpush3.bf16.msra.mxu1 %v2754_v12  ;;  %v270_v12 = vsub.s32 2, %v261_v1 }
  0xe5   :  { %2388 = vmatprep.subr.bf16.mxu1 %v2755_v50 }
  0xe7   :  { %2375 = vmatpush3.bf16.msra.mxu0 %v2748_v23 }
  0xe8   :  { %2376 = vmatprep.subr.bf16.mxu0 %v2749_v47  ;;  %2389 = vmatpush3.bf16.msra.mxu1 %v2756_v51 }
  0xe9   :  { %2390 = vmatprep.subr.bf16.mxu1 %v2757_v52 }
  0xeb   :  { %2377 = vmatpush3.bf16.msra.mxu0 %v2750_v48 }
  0xec   :  { %2391 = vmatpush3.bf16.msra.mxu1 %v2758_v53  ;;  %v275_v53 = vrot.slane %v258_v7, %v274_v49 }
  0xed   :  { %2392 = vmatprep.subr.bf16.mxu1 %v2759_v44  ;;  %v271_v44 = vrot.slane %v258_v7, %v270_v12 }
  0xf0   :  { %2393 = vmatpush3.bf16.msra.mxu1 %v2760_v55 }
  0xf1   :  { %2394 = vmatprep.subr.bf16.mxu1 %v2761_v56 }
  0xf4   :  { %2395 = vmatpush3.bf16.msra.mxu1 %v2762_v57 }
  0xf5   :  { %2396 = vmatprep.subr.bf16.mxu1 %v2763_v58 }
  0xf8   :  { %2397 = vmatpush3.bf16.msra.mxu1 %v2764_v59 }
  0xf9   :  { %2398 = vmatprep.subr.bf16.mxu1 %v2765_v60 }
  0xfc   :  { %2399 = vmatpush3.bf16.msra.mxu1 %v2766_v61 }
 0x10e   :  { %v1298_v2 = vpop.f32.mrf.mxu0 }
 0x10f   :  { %v1341_v62 = vpop.f32.mrf.mxu1  ;;  %v1299_v16 = vadd.f32 %v1298_v2, %v263_v10 }
 0x110   :  { %v1300_v6 = vpop.f32.mrf.mxu0 }
 0x111   :  { %v1343_v0 = vpop.f32.mrf.mxu1  ;;  %v1301_v15 = vadd.f32 %v1300_v6, %v267_v9  ;;  %v1342_v25 = vadd.f32 %v1341_v62, %v1299_v16 }
 0x112   :  { %v1302_v11 = vpop.f32.mrf.mxu0 }
 0x113   :  { %v1345_v3 = vpop.f32.mrf.mxu1  ;;  %v1303_v18 = vadd.f32 %v1302_v11, %v263_v10  ;;  %v1344_v22 = vadd.f32 %v1343_v0, %v1301_v15 }
 0x114   :  { %v1304_v17 = vpop.f32.mrf.mxu0 }
 0x115   :  { %v1347_v8 = vpop.f32.mrf.mxu1  ;;  %v1305_v24 = vadd.f32 %v1304_v17, %v267_v9  ;;  %v1346_v28 = vadd.f32 %v1345_v3, %v1303_v18 }
 0x117   :  { %v1427_v14 = vpop.f32.mrf.mxu1  ;;  %v1348_v33 = vadd.f32 %v1347_v8, %v1305_v24  ;;  %v2809_v24 = vmov 0.0  }
 0x118   :  { %2415 = vmatprep.subr.bf16.mxu0 %v2809_v24 }
 0x119   :  { %v1429_v19 = vpop.f32.mrf.mxu1 }
 0x11b   :  { %v1431_v30 = vpop.f32.mrf.mxu1 }
 0x11d   :  { %v1433_v39 = vpop.f32.mrf.mxu1 }
 0x14e   :  { %v1384_v20 = vpop.f32.mrf.mxu0 }
 0x14f   :  { %v1385_v31 = vadd.f32 %v1384_v20, %v1342_v25  ;;  %v2767_v20 = vld [vmem:[%s3065_s5 + $0x38] sm:$0xff]  }
 0x150   :  { %v1386_v27 = vpop.f32.mrf.mxu0 }
 0x151   :  { %v1387_v29 = vadd.f32 %v1386_v27, %v1344_v22  ;;  %v1428_v13 = vadd.f32 %v1427_v14, %v1385_v31  ;;  %v2768_v27 = vld [vmem:[%s3065_s5 + $0x30] sm:$0xff]   ;;  %v2771_v31 = vld [vmem:[%s3065_s5 + $0x18] sm:$0xff]  }
 0x152   :  { %v1388_v32 = vpop.f32.mrf.mxu0 }
 0x153   :  { %v1389_v34 = vadd.f32 %v1388_v32, %v1346_v28  ;;  %v1430_v36 = vadd.f32 %v1429_v19, %v1387_v29  ;;  %v1608_v21 = vmax.f32 %v1428_v13, 0.0  ;;  %v2769_v29 = vld [vmem:[%s3065_s5 + $0x28] sm:$0xff]   ;;  %v2772_v32 = vld [vmem:[%s3065_s5 + $0x10] sm:$0xff]  }
 0x154   :  { %v1390_v35 = vpop.f32.mrf.mxu0 }
 0x155   :  { %v1432_v37 = vadd.f32 %v1431_v30, %v1389_v34  ;;  %v1391_v38 = vadd.f32 %v1390_v35, %v1348_v33  ;;  %v1609_v42 = vmax.f32 %v1430_v36, 0.0  ;;  %v2770_v30 = vld [vmem:[%s3065_s5 + $0x20] sm:$0xff]   ;;  %v2773_v33 = vld [vmem:[%s3065_s5 + $0x8] sm:$0xff]  }
 0x156   :  { %v2774_v34 = vld [vmem:[%s3065_s5] sm:$0xff]  }
 0x157   :  { %v1434_v40 = vadd.f32 %v1433_v39, %v1391_v38  ;;  %v1612_v41 = vmax.f32 %v1432_v37, 0.0  ;;  %v1470_v54 = vpop.f32.mrf.mxu1 }
 0x158   :  { %v1471_v60 = vadd.f32 %v1470_v54, %v271_v44 }
 0x159   :  { %v1613_v43 = vmax.f32 %v1434_v40, 0.0  ;;  %v1616_v45 = vpack.c.bf16 %v1612_v41, %v1608_v21  ;;  %v1472_v46 = vpop.f32.mrf.mxu1  ;;  %v2311_v40 = vld [vmem:[%s3064_s4] ss:$0 sm:$0xff] }
 0x15a   :  { %v1473_v58 = vadd.f32 %v1472_v46, %v275_v53 }
 0x15b   :  { %v1617_v26 = vpack.c.bf16 %v1613_v43, %v1609_v42  ;;  %v1474_v23 = vpop.f32.mrf.mxu1 }
 0x15c   :  { %v1475_v59 = vadd.f32 %v1474_v23, %v271_v44 }
 0x15d   :  { %1915 = vmatprep.mubr.bf16.mxu0 %v1617_v26  ;;  %v1476_v48 = vpop.f32.mrf.mxu1 }
 0x15e   :  { %1916 = vmatmul.mubr.bf16.vlgmr.msra.gmra.mxu0 %v1616_v45  ;;  %v1477_v63 = vadd.f32 %v1476_v48, %v275_v53 }
 0x15f   :  { %2416 = vmatpush3.bf16.msra.mxu0 %v2767_v20  ;;  %2431 = vmatprep.mubr.msk.bf16.mxu0 %vm2810_vm1, %v2809_v24 }
 0x160   :  { %2417 = vmatprep.subr.bf16.mxu0 %v2809_v24 }
 0x163   :  { %2418 = vmatpush3.bf16.msra.mxu0 %v2768_v27 }
 0x164   :  { %2419 = vmatprep.subr.bf16.mxu0 %v2809_v24 }
 0x167   :  { %2420 = vmatpush3.bf16.msra.mxu0 %v2769_v29 }
 0x168   :  { %2421 = vmatprep.subr.bf16.mxu0 %v2809_v24 }
 0x16b   :  { %2422 = vmatpush3.bf16.msra.mxu0 %v2770_v30 }
 0x16c   :  { %2423 = vmatprep.subr.bf16.mxu0 %v2809_v24 }
 0x16f   :  { %2424 = vmatpush3.bf16.msra.mxu0 %v2771_v31 }
 0x170   :  { %2425 = vmatprep.subr.bf16.mxu0 %v2809_v24 }
 0x173   :  { %2426 = vmatpush3.bf16.msra.mxu0 %v2772_v32 }
 0x174   :  { %2427 = vmatprep.subr.bf16.mxu0 %v2809_v24 }
 0x177   :  { %2428 = vmatpush3.bf16.msra.mxu0 %v2773_v33 }
 0x178   :  { %2429 = vmatprep.subr.bf16.mxu0 %v2809_v24 }
 0x17b   :  { %2430 = vmatpush3.bf16.msra.mxu0 %v2774_v34 }
 0x18e   :  { %v1513_v47 = vpop.f32.mrf.mxu0 }
 0x18f   :  { %v1514_v3 = vadd.f32 %v1513_v47, %v1471_v60 }
 0x190   :  { %v1515_v50 = vpop.f32.mrf.mxu0 }
 0x191   :  { %v1516_v0 = vadd.f32 %v1515_v50, %v1473_v58  ;;  %v2344_v50 = vld [vmem:[%s3066_s6] ss:$0 sm:$0xff] }
 0x192   :  { %v1517_v55 = vpop.f32.mrf.mxu0 }
 0x193   :  { %v1518_v2 = vadd.f32 %v1517_v55, %v1475_v59 }
 0x194   :  { %v1519_v61 = vpop.f32.mrf.mxu0 }
 0x195   :  { %v1520_v5 = vadd.f32 %v1519_v61, %v1477_v63 }
 0x197   :  { %v1556_v51 = vpop.f32.mrf.mxu1 }
 0x198   :  { %v1557_v8 = vadd.f32 %v1556_v51, %v1514_v3 }
 0x199   :  { %v1558_v52 = vpop.f32.mrf.mxu1 }
 0x19a   :  { %v1559_v1 = vadd.f32 %v1558_v52, %v1516_v0 }
 0x19b   :  { %v1560_v56 = vpop.f32.mrf.mxu1 }
 0x19c   :  { %v1561_v6 = vadd.f32 %v1560_v56, %v1518_v2 }
 0x19d   :  { %v1562_v57 = vpop.f32.mrf.mxu1 }
 0x19e   :  { %v1563_v10 = vadd.f32 %v1562_v57, %v1520_v5 }
 0x19f   :  { %v1599_v62 = vpop.f32.mrf.mxu1 }
 0x1a0   :  { %v1600_v14 = vadd.f32 %v1599_v62, %v1557_v8 }
 0x1a1   :  { %v1601_v4 = vpop.f32.mrf.mxu1 }
 0x1a2   :  { %v1602_v7 = vadd.f32 %v1601_v4, %v1559_v1  ;;  %v1610_v22 = vmax.f32 %v1600_v14, 0.0 }
 0x1a3   :  { %v1603_v9 = vpop.f32.mrf.mxu1 }
 0x1a4   :  { %v1604_v11 = vadd.f32 %v1603_v9, %v1561_v6  ;;  %v1611_v18 = vmax.f32 %v1602_v7, 0.0 }
 0x1a5   :  { %v1605_v15 = vpop.f32.mrf.mxu1 }
 0x1a6   :  { %v1606_v16 = vadd.f32 %v1605_v15, %v1563_v10  ;;  %v1614_v17 = vmax.f32 %v1604_v11, 0.0 }
 0x1a8   :  { %v1615_v19 = vmax.f32 %v1606_v16, 0.0  ;;  %v1618_v28 = vpack.c.bf16 %v1614_v17, %v1610_v22 }
 0x1aa   :  { %v1619_v25 = vpack.c.bf16 %v1615_v19, %v1611_v18 }
 0x1ac   :  { %1956 = vmatprep.mubr.bf16.mxu1 %v1619_v25 }
 0x1ad   :  { %1957 = vmatmul.mubr.bf16.vlgmr.msra.gmra.mxu1 %v1618_v28 }
 0x21e   :  { %v2378_v35 = vpop.f32.mrf.mxu0 }
 0x220   :  { %v2379_v36 = vpop.f32.mrf.mxu0 }
 0x221   :  { %v2380_v13 = vadd.f32 %v2379_v36, %v2378_v35 }
 0x222   :  { %v2381_v37 = vpop.f32.mrf.mxu0 }
 0x223   :  { %v1918_v26 = vadd.f32 %v2380_v13, %v2311_v40 }
 0x224   :  { %v2382_v38 = vpop.f32.mrf.mxu0 }
 0x225   :  { %v2383_v42 = vadd.f32 %v2382_v38, %v2381_v37 }
 0x227   :  { %v1921_v54 = vadd.f32 %v2383_v42, %v2311_v40 }
 0x26d   :  { %v2400_v39 = vpop.f32.mrf.mxu1 }
 0x26f   :  { %v2401_v41 = vpop.f32.mrf.mxu1 }
 0x270   :  { %v2402_v43 = vadd.f32 %v2401_v41, %v2400_v39 }
 0x271   :  { %v2403_v21 = vpop.f32.mrf.mxu1 }
 0x272   :  { %v1959_v46 = vadd.f32 %v2402_v43, %v1918_v26 }
 0x273   :  { %v2404_v45 = vpop.f32.mrf.mxu1 }
 0x274   :  { %v2405_v23 = vadd.f32 %v2404_v45, %v2403_v21  ;;  %v1965_v48 = vmax.f32 %v1959_v46, 0.0 }
 0x276   :  { %v1962_v47 = vadd.f32 %v2405_v23, %v1921_v54 }
 0x278   :  { %v1966_v49 = vmax.f32 %v1962_v47, 0.0 }
 0x27a   :  { %v1967_v12 = vpack.c.bf16 %v1966_v49, %v1965_v48 }
 0x27c   :  { %2432 = vmatmul.mubr.bf16.vlgmr.msra.gmra.mxu0 %v1967_v12 }
 0x33c   :  { %v2073_v51 = vpop.f32.mrf.mxu0 }
 0x33d   :  { %v2074_v52 = vadd.f32 %v2344_v50, %v2073_v51 }
 0x33e   :  { %v2433_v53 = vpop.f32.mrf.mxu0 }
 0x33f   :  { %2080 = vmax.xlane.f32.xlu0 %v2074_v52 }
 0x340   :  { %v2076_v44 = vpop.f32.mrf.mxu0 }
 0x341   :  { %v2077_v55 = vadd.f32 %v2344_v50, %v2076_v44 }
 0x342   :  { %v2434_v56 = vpop.f32.mrf.mxu0 }
 0x343   :  { %2082 = vmax.xlane.f32.xlu0 %v2077_v55 }
 0x3c8   :  { %v2081_v57 = vpop.xlane.xlu0 %2080 }
 0x3c9   :  { %v2084_v58 = vsub.f32 %v2074_v52, %v2081_v57 }
 0x3cb   :  { %v2086_v59 = vmul.f32 1.442695, %v2084_v58 }
 0x3cc   :  { %v2083_v60 = vpop.xlane.xlu0 %2082 }
 0x3cd   :  { %2775 = vpow2.f32 %v2086_v59  ;;  %v2085_v61 = vsub.f32 %v2077_v55, %v2083_v60 }
 0x3cf   :  { %v2088_v62 = vmul.f32 1.442695, %v2085_v61 }
 0x3d1   :  { %2777 = vpow2.f32 %v2088_v62 }
 0x3da   :  { %v2776_v63 = vpop.eup %2775 }
 0x3db   :  { %2090 = vadd.xlane.f32.xlu1 %v2776_v63 }
 0x3de   :  { %v2778_v0 = vpop.eup %2777 }
 0x3df   :  { %2092 = vadd.xlane.f32.xlu1 %v2778_v0 }
 0x464   :  { %v2091_v2 = vpop.xlane.xlu1 %2090 }
 0x465   :  { %2779 = vrcp.f32 %v2091_v2 }
 0x468   :  { %v2093_v3 = vpop.xlane.xlu1 %2092 }
 0x469   :  { %2781 = vrcp.f32 %v2093_v3 }
 0x472   :  { %v2780_v4 = vpop.eup %2779 }
 0x473   :  { %v2096_v1 = vmul.f32 %v2780_v4, %v2776_v63 }
 0x476   :  { %v2782_v5 = vpop.eup %2781 }
 0x477   :  { %v2097_v6 = vmul.f32 %v2782_v5, %v2778_v0 }
 0x479   :  { %v2360_v8 = vpack.c.bf16 %v2097_v6, %v2096_v1 }
 0x47b   :  { %2361 = vst [vmem:[%s3067_s7] sm:$0xff] %v2360_v8  }
 0x47c   :  { %2112 = vsyncpa [#allocation3], 1 }

</bundles_post_ra>
